<compile_context>
chip_gen: v7x
topology: tpu7x:2x2x1
jax: 0.10.0
libtpu: 0.0.40
codegen_flags: <defaults>
</compile_context>

<pallas_src>
import functools

import jax
import jax.numpy as jnp
from jax.experimental import pallas as pl
from jax.experimental.pallas import tpu as pltpu


def _ce_single_pass_kernel(pred_ref, tgt_ref, out_ref, *, n_total, tile_n):
    """Whole class axis in one block: plain (non-online) logsumexp, no scratch."""
    ni = pl.program_id(0)

    logits = pred_ref[...].astype(jnp.float32)              # (TILE_N, C)
    tgt = tgt_ref[...]                                       # (TILE_N, 1) int32
    col = jax.lax.broadcasted_iota(jnp.int32, logits.shape, 1)

    # Fused target-logit extraction (same pass as the exp-sum; no second traversal).
    t = jnp.sum(jnp.where(col == tgt, logits, 0.0), axis=-1, keepdims=True)

    m = jnp.max(logits, axis=-1, keepdims=True)
    l = jnp.sum(jnp.exp(logits - m), axis=-1, keepdims=True)
    per_row = (m + jnp.log(l)) - t                           # -log_softmax[target]

    if n_total % tile_n != 0:
        row = jax.lax.broadcasted_iota(jnp.int32, per_row.shape, 0) + ni * tile_n
        per_row = jnp.where(row < n_total, per_row, 0.0)
    out_ref[...] = per_row


def _ce_online_kernel(pred_ref, tgt_ref, out_ref, m_ref, l_ref, t_ref, *,
                      n_total, c_total, tile_n, tile_c):
    """Online (flash-style) logsumexp over (TILE_N, TILE_C) blocks of the class axis.

    pred_ref : (TILE_N, TILE_C) logits block (any float dtype, promoted in-register)
    tgt_ref  : (TILE_N, 1) int32 target class indices
    out_ref  : (TILE_N, 1) f32 per-row loss (written on the last class step)
    m/l/t_ref: (TILE_N, 1) f32 scratch -- running max, running exp-sum, target logit.
    """
    ni = pl.program_id(0)
    ci = pl.program_id(1)
    last_c = pl.num_programs(1) - 1

    @pl.when(ci == 0)
    def _init():
        m_ref[...] = jnp.full(m_ref.shape, -jnp.inf, dtype=m_ref.dtype)
        l_ref[...] = jnp.zeros(l_ref.shape, dtype=l_ref.dtype)
        t_ref[...] = jnp.zeros(t_ref.shape, dtype=t_ref.dtype)

    logits = pred_ref[...].astype(jnp.float32)               # (TILE_N, TILE_C)
    # Fold the block offset into the scalar side: compare the un-offset iota against
    # (tgt - ci*tile_c) instead of materializing a full-width (iota + ci*tile_c).
    col = jax.lax.broadcasted_iota(jnp.int32, logits.shape, 1)
    tgt_local = tgt_ref[...] - ci * tile_c                    # (TILE_N, 1)

    def _update(lg):
        # Fused target-logit extraction + online logsumexp update.
        t_ref[...] += jnp.sum(jnp.where(col == tgt_local, lg, 0.0),
                              axis=-1, keepdims=True)
        m_old = m_ref[...]
        m_new = jnp.maximum(m_old, jnp.max(lg, axis=-1, keepdims=True))
        l_ref[...] = (l_ref[...] * jnp.exp(m_old - m_new)
                      + jnp.sum(jnp.exp(lg - m_new), axis=-1, keepdims=True))
        m_ref[...] = m_new

    if c_total % tile_c == 0:
        _update(logits)
    else:
        # Only the last class tile is ragged: interior blocks skip the mask entirely.
        num_c_tiles = -(-c_total // tile_c)
        c_rem = c_total - (num_c_tiles - 1) * tile_c

        @pl.when(ci < last_c)
        def _interior():
            _update(logits)

        @pl.when(ci == last_c)
        def _ragged():
            _update(jnp.where(col < c_rem, logits, -jnp.inf))

    @pl.when(ci == last_c)
    def _finalize():
        # -log_softmax[target] = logsumexp(logits) - logits[target]
        per_row = (m_ref[...] + jnp.log(l_ref[...])) - t_ref[...]
        if n_total % tile_n != 0:
            row = jax.lax.broadcasted_iota(jnp.int32, per_row.shape, 0) + ni * tile_n
            per_row = jnp.where(row < n_total, per_row, 0.0)
        out_ref[...] = per_row


def _vmem_budget():
    """(per-block byte budget for the logits tile, vmem_limit_bytes) per chip gen."""
    try:
        info = pltpu.get_tpu_info()
        vmem_bytes = int(getattr(info, "vmem_capacity_bytes", 64 * 1024 * 1024))
    except Exception:
        vmem_bytes = 64 * 1024 * 1024        # conservative fallback (v7x per-TC)
    if vmem_bytes >= 100 * 1024 * 1024:      # v5e / v6e: 128 MiB physical VMEM
        return 32 * 1024 * 1024, 100 * 1024 * 1024
    return 16 * 1024 * 1024, 56 * 1024 * 1024   # v7x: 64 MiB per TensorCore


def cross_entropy_loss(targets, predictions, *, tile_n=None, tile_c=None):
    """Equivalent of F.cross_entropy(predictions, targets) (class indices, mean)."""
    n, c = predictions.shape
    itemsize = jnp.dtype(predictions.dtype).itemsize
    block_budget, vmem_limit = _vmem_budget()

    # --- N tiling: "parallel" axis.  Guarantee >= 2 tiles whenever n > 8 so both
    # v7x TensorCores get work; costs one extra grid step on single-TC chips.
    if tile_n is None:
        tile_n = min(512, n)
        if n > 8 and (n + tile_n - 1) // tile_n == 1:
            tile_n = ((-(-n // 2)) + 7) // 8 * 8        # ceil(n/2), rounded up to x8
    tile_n = min(tile_n, n)

    # --- C tiling: biggest lane-dense class tile that fits the per-block budget
    # (dtype-aware: bf16 inputs get 2x the lanes of f32 at the same byte budget).
    if tile_c is None:
        cols = max(128, (block_budget // (tile_n * itemsize)) // 128 * 128)
        tile_c = c if cols >= c else cols
    tile_c = min(tile_c, c)

    tgt = targets.astype(jnp.int32).reshape(n, 1)
    n_tiles_n = (n + tile_n - 1) // tile_n
    n_tiles_c = (c + tile_c - 1) // tile_c

    if n_tiles_c == 1:
        # Whole class axis fits one block: single-pass kernel, no scratch carry.
        per_row = pl.pallas_call(
            functools.partial(_ce_single_pass_kernel, n_total=n, tile_n=tile_n),
            out_shape=jax.ShapeDtypeStruct((n, 1), jnp.float32),
            grid_spec=pltpu.PrefetchScalarGridSpec(
                num_scalar_prefetch=0,
                grid=(n_tiles_n,),
                in_specs=[
                    pl.BlockSpec((tile_n, c), lambda i: (i, 0)),
                    pl.BlockSpec((tile_n, 1), lambda i: (i, 0)),
                ],
                out_specs=pl.BlockSpec((tile_n, 1), lambda i: (i, 0)),
            ),
            compiler_params=pltpu.CompilerParams(
                dimension_semantics=("parallel",),
                vmem_limit_bytes=vmem_limit,
            ),
        )(predictions, tgt)
    else:
        per_row = pl.pallas_call(
            functools.partial(_ce_online_kernel, n_total=n, c_total=c,
                              tile_n=tile_n, tile_c=tile_c),
            out_shape=jax.ShapeDtypeStruct((n, 1), jnp.float32),
            grid_spec=pltpu.PrefetchScalarGridSpec(
                num_scalar_prefetch=0,
                grid=(n_tiles_n, n_tiles_c),
                in_specs=[
                    pl.BlockSpec((tile_n, tile_c), lambda i, j: (i, j)),
                    pl.BlockSpec((tile_n, 1), lambda i, j: (i, 0)),
                ],
                out_specs=pl.BlockSpec((tile_n, 1), lambda i, j: (i, 0)),
                scratch_shapes=[pltpu.VMEM((tile_n, 1), jnp.float32)] * 3,
            ),
            compiler_params=pltpu.CompilerParams(
                dimension_semantics=("parallel", "arbitrary"),
                vmem_limit_bytes=vmem_limit,
            ),
        )(predictions, tgt)

    # Tiny final reduction in plain JAX; mean over the true global N.
    return jnp.sum(per_row) / jnp.float32(n)


if __name__ == "__main__":
    key = jax.random.PRNGKey(0)
    k1, k2, k3, k4, k5, k6 = jax.random.split(key, 6)

    def ref_ce(tgts, preds):
        lp = jax.nn.log_softmax(preds.astype(jnp.float32), axis=-1)
        return -jnp.mean(lp[jnp.arange(preds.shape[0]), tgts])

    # Case 1: small shapes consistent with the module -> single-pass kernel path.
    n1, c1 = 8, 32
    preds1 = jax.random.normal(k1, (n1, c1), dtype=jnp.float32)
    tgts1 = jax.random.randint(k2, (n1,), 0, c1, dtype=jnp.int32)
    loss1 = jax.block_until_ready(jax.jit(cross_entropy_loss)(tgts1, preds1))
    ref1 = ref_ce(tgts1, preds1)
    assert jnp.allclose(loss1, ref1, atol=1e-5, rtol=1e-5), (loss1, ref1)

    # Case 2: online (tiled-C) path with ragged N and ragged C (3x3 grid).
    n2, c2 = 20, 300
    preds2 = jax.random.normal(k3, (n2, c2), dtype=jnp.float32)
    tgts2 = jax.random.randint(k4, (n2,), 0, c2, dtype=jnp.int32)
    tiled = jax.jit(functools.partial(cross_entropy_loss, tile_n=8, tile_c=128))
    loss2 = jax.block_until_ready(tiled(tgts2, preds2))
    ref2 = ref_ce(tgts2, preds2)
    assert jnp.allclose(loss2, ref2, atol=1e-5, rtol=1e-5), (loss2, ref2)

    # Case 3: auto heuristics on the same data (>= 2 N-tiles for megacore,
    # single-pass C since the whole vocab fits one block).
    loss3 = jax.block_until_ready(jax.jit(cross_entropy_loss)(tgts2, preds2))
    assert jnp.allclose(loss3, ref2, atol=1e-5, rtol=1e-5), (loss3, ref2)

    # Case 4: bf16 logits through the online path (promoted to f32 in-kernel).
    n4, c4 = 16, 384
    preds4 = jax.random.normal(k5, (n4, c4), dtype=jnp.bfloat16)
    tgts4 = jax.random.randint(k6, (n4,), 0, c4, dtype=jnp.int32)
    tiled4 = jax.jit(functools.partial(cross_entropy_loss, tile_n=8, tile_c=128))
    loss4 = jax.block_until_ready(tiled4(tgts4, preds4))
    ref4 = ref_ce(tgts4, preds4)
    assert jnp.allclose(loss4, ref4, atol=1e-4, rtol=1e-4), (loss4, ref4)

    print("KERNEL_OK")
</pallas_src>

<mosaic_0001>
module attributes {stable_mosaic.version = 11 : i64} {
  func.func @_ce_single_pass_kernel(%arg0: i32, %arg1: memref<8x32xf32, #tpu.memory_space<vmem>>, %arg2: memref<8x1xi32, #tpu.memory_space<vmem>>, %arg3: memref<8x1xf32, #tpu.memory_space<vmem>>) attributes {dimension_semantics = [#tpu.dimension_semantics<parallel>], iteration_bounds = array<i64: 1>, scalar_prefetch = 0 : i64, scratch_operands = 0 : i64, tpu.core_type = #tpu.core_type<tc>, window_params = [{transform_indices = @transform_0, window_bounds = array<i64: 8, 32>}, {transform_indices = @transform_1, window_bounds = array<i64: 8, 1>}, {transform_indices = @transform_2, window_bounds = array<i64: 8, 1>}]} {
    %c0 = arith.constant 0 : index
    %c0_0 = arith.constant 0 : index
    %0 = vector.load %arg1[%c0, %c0_0] : memref<8x32xf32, #tpu.memory_space<vmem>>, vector<8x32xf32>
    %c0_1 = arith.constant 0 : index
    %c0_2 = arith.constant 0 : index
    %1 = vector.load %arg2[%c0_1, %c0_2] : memref<8x1xi32, #tpu.memory_space<vmem>>, vector<8x1xi32>
    %2 = tpu.iota {dimensions = array<i32: 1>} : vector<8x32xi32>
    %3 = vector.broadcast %1 : vector<8x1xi32> to vector<8x32xi32>
    %4 = arith.cmpi eq, %2, %3 : vector<8x32xi32>
    %cst = arith.constant 0.000000e+00 : f32
    %5 = vector.broadcast %cst : f32 to vector<8x32xf32>
    %6 = arith.select %4, %0, %5 : vector<8x32xi1>, vector<8x32xf32>
    %cst_3 = arith.constant dense<0.000000e+00> : vector<8xf32>
    %7 = vector.multi_reduction <add>, %6, %cst_3 [1] : vector<8x32xf32> to vector<8xf32>
    %8 = vector.shape_cast %7 : vector<8xf32> to vector<8x1xf32>
    %cst_4 = arith.constant dense<0xFF800000> : vector<8xf32>
    %9 = vector.multi_reduction <maximumf>, %0, %cst_4 [1] : vector<8x32xf32> to vector<8xf32>
    %10 = vector.shape_cast %9 : vector<8xf32> to vector<8x1xf32>
    %11 = vector.broadcast %10 : vector<8x1xf32> to vector<8x32xf32>
    %12 = arith.subf %0, %11 : vector<8x32xf32>
    %13 = math.exp %12 : vector<8x32xf32>
    %cst_5 = arith.constant dense<0.000000e+00> : vector<8xf32>
    %14 = vector.multi_reduction <add>, %13, %cst_5 [1] : vector<8x32xf32> to vector<8xf32>
    %15 = vector.shape_cast %14 : vector<8xf32> to vector<8x1xf32>
    %16 = math.log %15 : vector<8x1xf32>
    %17 = arith.addf %10, %16 : vector<8x1xf32>
    %18 = arith.subf %17, %8 : vector<8x1xf32>
    %c0_6 = arith.constant 0 : index
    %c0_7 = arith.constant 0 : index
    %19 = vector.load %arg3[%c0_6, %c0_7] : memref<8x1xf32, #tpu.memory_space<vmem>>, vector<8x1xf32>
    tpu.vector_store %arg3[%c0_6, %c0_7], %18 {strides = array<i32>} : memref<8x1xf32, #tpu.memory_space<vmem>>, vector<8x1xf32>,
    return
  }
  func.func @transform_0(%arg0: i32) -> (i32, i32) {
    %c0_i32 = arith.constant 0 : i32
    %c0_i32_0 = arith.constant 0 : i32
    return %arg0, %c0_i32 : i32, i32
  }
  func.func @transform_1(%arg0: i32) -> (i32, i32) {
    %c0_i32 = arith.constant 0 : i32
    %c0_i32_0 = arith.constant 0 : i32
    return %arg0, %c0_i32 : i32, i32
  }
  func.func @transform_2(%arg0: i32) -> (i32, i32) {
    %c0_i32 = arith.constant 0 : i32
    %c0_i32_0 = arith.constant 0 : i32
    return %arg0, %c0_i32 : i32, i32
  }
}

</mosaic_0001>

<bundles_post_ra>
// kernel: cross_entropy_loss.1
= control target key start
LH: loop header
LB: loop body
LE: loop exit
PB: predicated region body
PF: predicated region fallthrough
CT: control target
= control target key end

     0   :  { %vm20_vm0 = vcmask 261120   ;;  %v49_v1 = vmov 0   ;;  %v13_v7 = vlaneseq  ;;  %vm37_vm2 = vcmask 7168   ;;  %s77_s0 = inlined_call_operand.vmem [shape: f32[8,32], index: 0, kind: input, shape index: {}]   ;;  %s78_s1 = inlined_call_operand.vmem [shape: s32[8,1], index: 1, kind: input, shape index: {}]   ;;  %s79_s2 = inlined_call_operand.vmem [shape: f32[8,1], index: 2, kind: output, shape index: {}]  }
   0x1   :  { %v11_v0 = vld [vmem:[%s77_s0] sm:$0xff]  ;;  %44 = vset.pattern.permute.xlu0 %v49_v1 }
   0x2   :  { %v24_v2 = vsel %vm20_vm0, %v11_v0, -inf  ;;  %v12_v3 = vld [vmem:[%s78_s1] sm:$0xff]  ;;  %v14_v8 = vand.u32 127, %v13_v7 }
   0x3   :  { %25 = vmax.xlane.f32.xlu0 %v24_v2 }
  0x19   :  { %16 = vperm.xlu0 %44, %v12_v3  }
  0x90   :  { %v26_v4 = vpop.xlane.xlu0 %25 }
  0x91   :  { %v27_v5 = vsub.f32 %v11_v0, %v26_v4 }
  0x93   :  { %v28_v6 = vmul.f32 1.442695, %v27_v5 }
  0x95   :  { %45 = vpow2.f32 %v28_v6 }
  0x98   :  { %v17_v9 = vpop.permute.xlu0 %16 }
  0x99   :  { %vm18_vm1 = vcmp.eq.s32.totalorder %v14_v8, %v17_v9 }
  0x9a   :  { %v19_v11 = vsel %vm18_vm1, %v11_v0, 0.0 }
  0x9b   :  { %v21_v13 = vsel %vm20_vm0, %v19_v11, 0.0 }
  0x9f   :  { %v46_v10 = vpop.eup %45 }
  0xa0   :  { %v30_v12 = vsel %vm20_vm0, %v46_v10, 0.0 }
  0xa1   :  { %31 = vadd.xlane.f32.xlu1 %v30_v12 }
  0xa5   :  { %22 = vadd.xlane.f32.xlu1 %v21_v13 }
 0x12e   :  { %v32_v14 = vpop.xlane.xlu1 %31 }
 0x12f   :  { %47 = vlog2.f32 %v32_v14 }
 0x132   :  { %v23_v17 = vpop.xlane.xlu1 %22 }
 0x139   :  { %v48_v15 = vpop.eup %47 }
 0x13a   :  { %v34_v16 = vmul.f32 0.6931472, %v48_v15 }
 0x13c   :  { %v35_v18 = vadd.f32 %v34_v16, %v26_v4 }
 0x13e   :  { %v36_v19 = vsub.f32 %v35_v18, %v23_v17 }
 0x140   :  { %38 = vst.msk [vmem:[%s79_s2] sm:$0xff] %vm37_vm2, %v36_v19 }

</bundles_post_ra>
